<compile_context>
chip_gen: v7x
topology: tpu7x:2x2x1
jax: 0.10.0
libtpu: 0.0.40
codegen_flags: <defaults>
</compile_context>

<pallas_src>
import jax
import jax.numpy as jnp
from jax.experimental import pallas as pl
from jax.experimental.pallas import tpu as pltpu

d_hidden = 256
n_vocab = 59

_D_HALF = d_hidden // 2          # 128: per-token embedding width
_VOCAB_PAD = 64                  # per-token vocab slot count inside the 128-lane one-hot
_OUT_PAD = 128                   # logits padded to a full lane width (unmasked stores)
_BLOCK_B = 2048                  # max batch tile (multiple of 16); VMEM-safe on all gens
_B_ALIGN = 16                    # sublane alignment (bf16 output tiles pack 16 rows/vreg)
_COMPUTE_DTYPE = jnp.bfloat16    # MXU-native on v5e / v6e / v7x


def _round_up(x, m):
    return ((x + m - 1) // m) * m


def _fused_kernel(tok_ref, t_ref, u_ref, o_ref):
    # tok_ref : [TB, 2]    int32 token ids
    # t_ref   : [128, 256] bf16  folded (embed @ W1^T) table, bias in rows 0..58
    # u_ref   : [256, 128] bf16  unembed.weight.T zero-padded on lanes
    # o_ref   : [TB, 128]  bf16  padded logits
    tok = tok_ref[...]                                               # [TB, 2]
    tb = tok.shape[0]

    # Single lane-dense one-hot: lanes [0,64) select token0, [64,128) token1.
    ids = jax.lax.broadcasted_iota(jnp.int32, (tb, 2 * _VOCAB_PAD), 1)
    sel = jnp.logical_or(ids == tok[:, 0:1], (ids - _VOCAB_PAD) == tok[:, 1:2])
    oh = jnp.where(sel, 1.0, 0.0).astype(t_ref.dtype)                # [TB, 128]

    # Gather + concat + Linear + bias, all as one MXU matmul; ReLU in f32.
    h = jnp.dot(oh, t_ref[...], preferred_element_type=jnp.float32)  # [TB, 256]
    h = jnp.maximum(h, 0.0)

    # Lane-dense (128-wide) padded-logit store in bf16.
    logits = jnp.dot(h.astype(u_ref.dtype), u_ref[...],
                     preferred_element_type=jnp.float32)             # [TB, 128]
    o_ref[...] = logits.astype(o_ref.dtype)


def prepare_params(embed_w, unembed_w, l1_w, l1_b):
    """One-time layout prep (outside the hot path): fold / pad / transpose / cast."""
    embed_w = embed_w.astype(jnp.float32)
    l1_w = l1_w.astype(jnp.float32)
    l1_b = l1_b.astype(jnp.float32)

    emb_pad = jnp.zeros((_VOCAB_PAD, _D_HALF), jnp.float32).at[:n_vocab].set(embed_w)
    t0 = emb_pad @ l1_w[:, :_D_HALF].T                                # [64, 256]
    t1 = emb_pad @ l1_w[:, _D_HALF:].T                                # [64, 256]
    # Each row of the token-0 one-hot is selected exactly once -> fold b1 there.
    t0 = t0.at[:n_vocab].add(l1_b)
    t = jnp.concatenate([t0, t1], axis=0).astype(_COMPUTE_DTYPE)      # [128, 256]

    u_pad_t = jnp.zeros((d_hidden, _OUT_PAD), jnp.float32)
    u_pad_t = u_pad_t.at[:, :n_vocab].set(unembed_w.astype(jnp.float32).T)
    u_pad_t = u_pad_t.astype(_COMPUTE_DTYPE)                          # [256, 128]
    return t, u_pad_t


@jax.jit
def my_model_d_forward(tokens, params):
    """tokens: [B, 2] int32. Returns logits [B, n_vocab] f32."""
    t, u_pad_t = params
    B = tokens.shape[0]

    # Tile: big enough to amortize per-step overhead, but aim for >=2 grid
    # steps so v7x's two TensorCores both get work via the parallel axis.
    # NOTE: B is a static (trace-time) shape; in a serving setting, pad B to a
    # small set of fixed buckets before calling to avoid jit recompiles.
    tb = min(_BLOCK_B, max(_B_ALIGN, _round_up(-(-B // 2), _B_ALIGN)))
    b_pad = _round_up(B, tb)
    if b_pad != B:
        tokens = jnp.pad(tokens, ((0, b_pad - B), (0, 0)))            # pad rows -> id 0

    out_pad = pl.pallas_call(
        _fused_kernel,
        out_shape=jax.ShapeDtypeStruct((b_pad, _OUT_PAD), _COMPUTE_DTYPE),
        grid=(b_pad // tb,),
        in_specs=[
            pl.BlockSpec((tb, 2), lambda i: (i, 0)),                       # tokens: tiled over B
            pl.BlockSpec((2 * _VOCAB_PAD, d_hidden), lambda i: (0, 0)),    # folded table: resident
            pl.BlockSpec((d_hidden, _OUT_PAD), lambda i: (0, 0)),          # unembed^T: resident
        ],
        out_specs=pl.BlockSpec((tb, _OUT_PAD), lambda i: (i, 0)),
        compiler_params=pltpu.CompilerParams(
            dimension_semantics=("parallel",),
            vmem_limit_bytes=32 * 1024 * 1024),
    )(tokens, t, u_pad_t)

    # Padded lanes (>= n_vocab) are exactly zero and padded batch rows are
    # meaningless; slice both away and upcast to f32 in one fused XLA op.
    return out_pad[:B, :n_vocab].astype(jnp.float32)


def init_params(key):
    """Deterministic synthetic parameters matching MyModelD.__init__ shapes."""
    k_embed, k_unembed, k_w, k_b = jax.random.split(key, 4)
    # nn.Embedding default init: N(0, 1); module then divides by sqrt(dim).
    embed_w = jax.random.normal(k_embed, (n_vocab, d_hidden // 2), jnp.float32)
    embed_w = embed_w / (d_hidden // 2) ** 0.5
    unembed_w = jax.random.normal(k_unembed, (n_vocab, d_hidden), jnp.float32)
    unembed_w = unembed_w / d_hidden ** 0.5
    # nn.Linear default init: U(-1/sqrt(fan_in), 1/sqrt(fan_in)).
    bound = 1.0 / d_hidden ** 0.5
    l1_w = jax.random.uniform(k_w, (d_hidden, d_hidden), jnp.float32, -bound, bound)
    l1_b = jax.random.uniform(k_b, (d_hidden,), jnp.float32, -bound, bound)
    return embed_w, unembed_w, l1_w, l1_b


if __name__ == "__main__":
    key = jax.random.PRNGKey(0)
    k_params, k_tok = jax.random.split(key)
    embed_w, unembed_w, l1_w, l1_b = init_params(k_params)
    params = prepare_params(embed_w, unembed_w, l1_w, l1_b)

    B = 8
    tokens = jax.random.randint(k_tok, (B, 2), 0, n_vocab, dtype=jnp.int32)

    out = my_model_d_forward(tokens, params)
    out = jax.block_until_ready(out)

    # Pure-JAX f32 reference of the same forward pass.
    e_cat = jnp.concatenate([embed_w[tokens[:, 0]], embed_w[tokens[:, 1]]], axis=1)
    ref = jnp.maximum(e_cat @ l1_w.T + l1_b, 0.0) @ unembed_w.T

    assert out.shape == (B, n_vocab)
    assert out.dtype == jnp.float32
    # bf16 folded table / unembed / output with f32 accumulation -> loosened
    # tolerance vs the pure-f32 reference.
    assert jnp.allclose(out, ref, atol=1e-2, rtol=5e-2), float(jnp.max(jnp.abs(out - ref)))

    print("KERNEL_OK")
</pallas_src>

<mosaic_0001>
module attributes {stable_mosaic.version = 11 : i64} {
  func.func @_fused_kernel(%arg0: i32, %arg1: memref<16x2xi32, #tpu.memory_space<vmem>>, %arg2: memref<128x256xbf16, #tpu.memory_space<vmem>>, %arg3: memref<256x128xbf16, #tpu.memory_space<vmem>>, %arg4: memref<16x128xbf16, #tpu.memory_space<vmem>>) attributes {dimension_semantics = [#tpu.dimension_semantics<parallel>], iteration_bounds = array<i64: 1>, scalar_prefetch = 0 : i64, scratch_operands = 0 : i64, tpu.core_type = #tpu.core_type<tc>, window_params = [{transform_indices = @transform_0, window_bounds = array<i64: 16, 2>}, {pipeline_mode = #tpu.pipeline_mode<synchronous>, transform_indices = @transform_1, window_bounds = array<i64: 128, 256>}, {pipeline_mode = #tpu.pipeline_mode<synchronous>, transform_indices = @transform_2, window_bounds = array<i64: 256, 128>}, {transform_indices = @transform_3, window_bounds = array<i64: 16, 128>}]} {
    %c0 = arith.constant 0 : index
    %c0_0 = arith.constant 0 : index
    %0 = vector.load %arg1[%c0, %c0_0] : memref<16x2xi32, #tpu.memory_space<vmem>>, vector<16x2xi32>
    %1 = tpu.iota {dimensions = array<i32: 1>} : vector<16x128xi32>
    %2 = vector.extract_strided_slice %0 {offsets = [0, 0], sizes = [16, 1], strides = [1, 1]} : vector<16x2xi32> to vector<16x1xi32>
    %3 = vector.broadcast %2 : vector<16x1xi32> to vector<16x128xi32>
    %4 = arith.cmpi eq, %1, %3 : vector<16x128xi32>
    %c64_i32 = arith.constant 64 : i32
    %5 = vector.broadcast %c64_i32 : i32 to vector<16x128xi32>
    %6 = arith.subi %1, %5 : vector<16x128xi32>
    %7 = vector.extract_strided_slice %0 {offsets = [0, 1], sizes = [16, 1], strides = [1, 1]} : vector<16x2xi32> to vector<16x1xi32>
    %8 = vector.broadcast %7 : vector<16x1xi32> to vector<16x128xi32>
    %9 = arith.cmpi eq, %6, %8 : vector<16x128xi32>
    %10 = arith.ori %4, %9 : vector<16x128xi1>
    %cst = arith.constant 1.000000e+00 : f32
    %cst_1 = arith.constant 0.000000e+00 : f32
    %11 = vector.broadcast %cst : f32 to vector<16x128xf32>
    %12 = vector.broadcast %cst_1 : f32 to vector<16x128xf32>
    %13 = arith.select %10, %11, %12 : vector<16x128xi1>, vector<16x128xf32>
    %14 = arith.truncf %13 : vector<16x128xf32> to vector<16x128xbf16>
    %c0_2 = arith.constant 0 : index
    %c0_3 = arith.constant 0 : index
    %15 = vector.load %arg2[%c0_2, %c0_3] : memref<128x256xbf16, #tpu.memory_space<vmem>>, vector<128x256xbf16>
    %cst_4 = arith.constant dense<0.000000e+00> : vector<16x256xf32>
    %16 = tpu.matmul %14, %15, %cst_4 {dimension_numbers = #tpu.dot_dimension_numbers<[1], [0], [0], [1], [0, 0, 1, 1], [], []>} : vector<16x128xbf16>, vector<128x256xbf16>, vector<16x256xf32> -> vector<16x256xf32>
    %cst_5 = arith.constant 0.000000e+00 : f32
    %17 = vector.broadcast %cst_5 : f32 to vector<16x256xf32>
    %18 = arith.maximumf %16, %17 : vector<16x256xf32>
    %19 = arith.truncf %18 : vector<16x256xf32> to vector<16x256xbf16>
    %c0_6 = arith.constant 0 : index
    %c0_7 = arith.constant 0 : index
    %20 = vector.load %arg3[%c0_6, %c0_7] : memref<256x128xbf16, #tpu.memory_space<vmem>>, vector<256x128xbf16>
    %cst_8 = arith.constant dense<0.000000e+00> : vector<16x128xf32>
    %21 = tpu.matmul %19, %20, %cst_8 {dimension_numbers = #tpu.dot_dimension_numbers<[1], [0], [0], [1], [0, 0, 1, 1], [], []>} : vector<16x256xbf16>, vector<256x128xbf16>, vector<16x128xf32> -> vector<16x128xf32>
    %22 = arith.truncf %21 : vector<16x128xf32> to vector<16x128xbf16>
    %c0_9 = arith.constant 0 : index
    %c0_10 = arith.constant 0 : index
    %23 = vector.load %arg4[%c0_9, %c0_10] : memref<16x128xbf16, #tpu.memory_space<vmem>>, vector<16x128xbf16>
    tpu.vector_store %arg4[%c0_9, %c0_10], %22 {strides = array<i32>} : memref<16x128xbf16, #tpu.memory_space<vmem>>, vector<16x128xbf16>,
    return
  }
  func.func @transform_0(%arg0: i32) -> (i32, i32) {
    %c0_i32 = arith.constant 0 : i32
    %c0_i32_0 = arith.constant 0 : i32
    return %arg0, %c0_i32 : i32, i32
  }
  func.func @transform_1(%arg0: i32) -> (i32, i32) {
    %c0_i32 = arith.constant 0 : i32
    %c0_i32_0 = arith.constant 0 : i32
    %c0_i32_1 = arith.constant 0 : i32
    return %c0_i32, %c0_i32_0 : i32, i32
  }
  func.func @transform_2(%arg0: i32) -> (i32, i32) {
    %c0_i32 = arith.constant 0 : i32
    %c0_i32_0 = arith.constant 0 : i32
    %c0_i32_1 = arith.constant 0 : i32
    return %c0_i32, %c0_i32_0 : i32, i32
  }
  func.func @transform_3(%arg0: i32) -> (i32, i32) {
    %c0_i32 = arith.constant 0 : i32
    %c0_i32_0 = arith.constant 0 : i32
    return %arg0, %c0_i32 : i32, i32
  }
}

</mosaic_0001>

<bundles_post_ra>
// kernel: my_model_d_forward.1
= control target key start
LH: loop header
LB: loop body
LE: loop exit
PB: predicated region body
PF: predicated region fallthrough
CT: control target
= control target key end

     0   :  { %8 = vsyncpa [#allocation3], 0  ;;  %s627_s0 = inlined_call_operand.vmem [shape: s32[16,2], index: 0, kind: input, shape index: {}]   ;;  %s628_s1 = inlined_call_operand.hbm [shape: bf16[128,256], index: 1, kind: input, shape index: {}]   ;;  %s629_s2 = inlined_call_operand.hbm [shape: bf16[256,128], index: 2, kind: input, shape index: {}]   ;;  %s630_s3 = inlined_call_operand.vmem [shape: bf16[16,128], index: 3, kind: output, shape index: {}]  }
   0x1   :  { %9 = vsyncpa [#allocation5], 0  ;;  %s565_s12 = smov [#allocation2]   ;;  %s517_s16 = scalar_lea.hbm %s628_s1, 2048 }
   0x2   :  { %s17_s13 = sshll.u32 %s565_s12, 4  ;;  %p518_p0 = scmp.ne.s32.totalorder %s628_s1, %s517_s16  ;;  %s18_s13 = int_to_ptr.vmem [resolvable:$true] %s17_s13 }
   0x3   :  { %p521_p1 = scmp.lt.u32.totalorder %s517_s16, %s628_s1 }
   0x5   :  { %p523_p2 = pnand %p521_p1, %p518_p0 }
   0x7   :  { %526 = shalt.err (!%p523_p2)
}
   0x8   :  { %s527_s21 = scalar_lea.vmem %s18_s13, 2048  ;;  %p532_p4 = scmp.lt.s32.totalorder %s18_s13, %s18_s13 }
   0x9   :  { %p528_p3 = scmp.ne.s32.totalorder %s18_s13, %s527_s21  ;;  %p533_p5 = scmp.lt.s32.totalorder %s527_s21, %s527_s21 }
   0xb   :  { %p534_p6 = por %p533_p5, %p532_p4 }
   0xd   :  { %p535_p7 = pnand %p534_p6, %p528_p3 }
   0xf   :  { %538 = shalt.err (!%p535_p7)
}
  0x10   :  { %s566_s22 = smov 128   ;;  %s567_s23 = smov 8  }
  0x11   :  { %23 = dma.hbm_to_vmem [thread:$0]  %s628_s1, 2048, %s18_s13, [#allocation3], %s566_s22, %s566_s22, %s567_s23  }
  0x12   :  { %s568_s26 = smov [#allocation4]   ;;  %s539_s30 = scalar_lea.hbm %s629_s2, 2048 }
  0x13   :  { %s29_s27 = sshll.u32 %s568_s26, 4  ;;  %p540_p8 = scmp.ne.s32.totalorder %s629_s2, %s539_s30  ;;  %s30_s27 = int_to_ptr.vmem [resolvable:$true] %s29_s27 }
  0x14   :  { %p543_p9 = scmp.lt.u32.totalorder %s539_s30, %s629_s2 }
  0x16   :  { %p545_p10 = pnand %p543_p9, %p540_p8 }
  0x18   :  { %548 = shalt.err (!%p545_p10)
}
  0x19   :  { %s549_s8 = scalar_lea.vmem %s30_s27, 2048  ;;  %p554_p12 = scmp.lt.s32.totalorder %s30_s27, %s30_s27 }
  0x1a   :  { %p550_p11 = scmp.ne.s32.totalorder %s30_s27, %s549_s8  ;;  %p555_p13 = scmp.lt.s32.totalorder %s549_s8, %s549_s8 }
  0x1c   :  { %p556_p0 = por %p555_p13, %p554_p12 }
  0x1e   :  { %p557_p1 = pnand %p556_p0, %p550_p11 }
  0x20   :  { %560 = shalt.err (!%p557_p1)
}
  0x21   :  { %s569_s1 = smov 64   ;;  %s570_s9 = smov 4  }
  0x22   :  { %35 = dma.hbm_to_vmem [thread:$0]  %s629_s2, 2048, %s30_s27, [#allocation5], %s569_s1, %s569_s1, %s570_s9  }
  0x23   :  { %561 = dma.done.wait [#allocation3], 2048  }
  0x24   :  { %562 = vsyncadd [#allocation3], 4294965248 }
  0x25   :  { %563 = dma.done.wait [#allocation5], 2048  }
  0x26   :  { %564 = vsyncadd [#allocation5], 4294965248  ;;  %v571_v0 = vmov 1   ;;  %v572_v1 = vmov 0   ;;  %v43_v2 = vld [vmem:[%s627_s0] sm:$0xff]  ;;  %v44_v3 = vld [vmem:[%s627_s0 + $0x8] sm:$0xff]  ;;  %v45_v32 = vlaneseq }
  0x27   :  { %475 = vset.pattern.permute.xlu1 %v571_v0  ;;  %474 = vset.pattern.permute.xlu0 %v572_v1  ;;  %v477_v4 = vld [vmem:[#allocation2 + $0x4] ss:$8 sps:$4 sm:$0xff]   ;;  %v479_v5 = vld [vmem:[#allocation2] ss:$8 sps:$4 sm:$0xff]   ;;  %v480_v6 = vld [vmem:[#allocation2 + $0x14] ss:$8 sps:$4 sm:$0xff]  }
  0x28   :  { %197 = vmatprep.mubr.bf16.mxu0 %v572_v1  ;;  %57 = vperm.xlu1 %475, %v43_v2   ;;  %v482_v7 = vld [vmem:[#allocation2 + $0x10] ss:$8 sps:$4 sm:$0xff]   ;;  %v483_v8 = vld [vmem:[#allocation2 + $0x24] ss:$8 sps:$4 sm:$0xff]   ;;  %v485_v9 = vld [vmem:[#allocation2 + $0x20] ss:$8 sps:$4 sm:$0xff]  }
  0x29   :  { %48 = vperm.xlu0 %474, %v43_v2   ;;  %165 = vmatprep.subr.bf16.mxu0 %v477_v4  ;;  %v486_v10 = vld [vmem:[#allocation2 + $0x34] ss:$8 sps:$4 sm:$0xff]   ;;  %v488_v11 = vld [vmem:[#allocation2 + $0x30] ss:$8 sps:$4 sm:$0xff]   ;;  %v489_v12 = vld [vmem:[#allocation2 + $0x44] ss:$8 sps:$4 sm:$0xff]  }
  0x2a   :  { %166 = vmatpush1.bf16.msra.mxu0 %v479_v5  ;;  %v501_v13 = vld [vmem:[#allocation4 + $0x40] sm:$0xff]   ;;  %v503_v16 = vld [vmem:[#allocation4 + $0x48] sm:$0xff]   ;;  %v505_v18 = vld [vmem:[#allocation4 + $0x50] sm:$0xff]   ;;  %v46_v33 = vand.u32 127, %v45_v32  ;;  %v573_v39 = vmov 1.0|1.0  }
  0x2b   :  { %167 = vmatprep.subr.bf16.mxu0 %v480_v6  ;;  %v502_v14 = vld [vmem:[#allocation4] sm:$0xff]   ;;  %443 = vmatprep.subr.bf16.mxu1 %v501_v13  ;;  %v504_v17 = vld [vmem:[#allocation4 + $0x8] sm:$0xff]   ;;  %v492_v19 = vld [vmem:[#allocation2 + $0x54] ss:$8 sps:$4 sm:$0xff]  }
  0x2c   :  { %60 = vperm.xlu1 %475, %v44_v3   ;;  %v491_v15 = vld [vmem:[#allocation2 + $0x40] ss:$8 sps:$4 sm:$0xff]   ;;  %444 = vmatpush3.bf16.msra.mxu1 %v502_v14  ;;  %v494_v20 = vld [vmem:[#allocation2 + $0x50] ss:$8 sps:$4 sm:$0xff]   ;;  %v495_v23 = vld [vmem:[#allocation2 + $0x64] ss:$8 sps:$4 sm:$0xff]  }
  0x2d   :  { %51 = vperm.xlu0 %474, %v44_v3   ;;  %445 = vmatprep.subr.bf16.mxu1 %v503_v16  ;;  %v506_v21 = vld [vmem:[#allocation4 + $0x10] sm:$0xff]   ;;  %v507_v22 = vld [vmem:[#allocation4 + $0x58] sm:$0xff]   ;;  %v497_v24 = vld [vmem:[#allocation2 + $0x60] ss:$8 sps:$4 sm:$0xff]   ;;  %v399_v34 = vadd.s32 4294967232, %v46_v33 }
  0x2e   :  { %168 = vmatpush1.bf16.msra.mxu0 %v482_v7  ;;  %v508_v25 = vld [vmem:[#allocation4 + $0x18] sm:$0xff]   ;;  %v509_v27 = vld [vmem:[#allocation4 + $0x60] sm:$0xff]   ;;  %v511_v30 = vld [vmem:[#allocation4 + $0x68] sm:$0xff]  }
  0x2f   :  { %169 = vmatprep.subr.bf16.mxu0 %v483_v8  ;;  %v498_v26 = vld [vmem:[#allocation2 + $0x74] ss:$8 sps:$4 sm:$0xff]   ;;  %v510_v28 = vld [vmem:[#allocation4 + $0x20] sm:$0xff]   ;;  %v500_v29 = vld [vmem:[#allocation2 + $0x70] ss:$8 sps:$4 sm:$0xff]  }
  0x30   :  { %446 = vmatpush3.bf16.msra.mxu1 %v504_v17  ;;  %v512_v31 = vld [vmem:[#allocation4 + $0x28] sm:$0xff]   ;;  %v513_v40 = vld [vmem:[#allocation4 + $0x70] sm:$0xff]   ;;  %v515_v42 = vld [vmem:[#allocation4 + $0x78] sm:$0xff]  }
  0x31   :  { %476 = vset.pattern.permute.xlu0 %v571_v0  ;;  %447 = vmatprep.subr.bf16.mxu1 %v505_v18  ;;  %v514_v41 = vld [vmem:[#allocation4 + $0x30] sm:$0xff]   ;;  %v516_v43 = vld [vmem:[#allocation4 + $0x38] sm:$0xff]  }
  0x32   :  { %170 = vmatpush1.bf16.msra.mxu0 %v485_v9 }
  0x33   :  { %171 = vmatprep.subr.bf16.mxu0 %v486_v10 }
  0x34   :  { %448 = vmatpush3.bf16.msra.mxu1 %v506_v21 }
  0x35   :  { %449 = vmatprep.subr.bf16.mxu1 %v507_v22 }
  0x36   :  { %172 = vmatpush1.bf16.msra.mxu0 %v488_v11 }
  0x37   :  { %173 = vmatprep.subr.bf16.mxu0 %v489_v12 }
  0x38   :  { %450 = vmatpush3.bf16.msra.mxu1 %v508_v25 }
  0x39   :  { %451 = vmatprep.subr.bf16.mxu1 %v509_v27 }
  0x3a   :  { %174 = vmatpush1.bf16.msra.mxu0 %v491_v15 }
  0x3b   :  { %175 = vmatprep.subr.bf16.mxu0 %v492_v19 }
  0x3c   :  { %452 = vmatpush3.bf16.msra.mxu1 %v510_v28 }
  0x3d   :  { %453 = vmatprep.subr.bf16.mxu1 %v511_v30 }
  0x3e   :  { %176 = vmatpush1.bf16.msra.mxu0 %v494_v20 }
  0x3f   :  { %177 = vmatprep.subr.bf16.mxu0 %v495_v23 }
  0x40   :  { %454 = vmatpush3.bf16.msra.mxu1 %v512_v31 }
  0x41   :  { %455 = vmatprep.subr.bf16.mxu1 %v513_v40 }
  0x42   :  { %178 = vmatpush1.bf16.msra.mxu0 %v497_v24 }
  0x43   :  { %179 = vmatprep.subr.bf16.mxu0 %v498_v26 }
  0x44   :  { %456 = vmatpush3.bf16.msra.mxu1 %v514_v41 }
  0x45   :  { %457 = vmatprep.subr.bf16.mxu1 %v515_v42 }
  0x46   :  { %180 = vmatpush1.bf16.msra.mxu0 %v500_v29 }
  0x48   :  { %458 = vmatpush3.bf16.msra.mxu1 %v516_v43 }
  0xa7   :  { %v58_v35 = vpop.permute.xlu1 %57 }
  0xa8   :  { %v49_v36 = vpop.permute.xlu0 %48  ;;  %vm62_vm0 = vcmp.eq.s32.totalorder %v399_v34, %v58_v35 }
  0xa9   :  { %vm53_vm1 = vcmp.eq.s32.totalorder %v46_v33, %v49_v36 }
  0xaa   :  { %vm64_vm2 = vmor %vm53_vm1, %vm62_vm0 }
  0xab   :  { %v61_v37 = vpop.permute.xlu1 %60 }
  0xac   :  { %v52_v38 = vpop.permute.xlu0 %51  ;;  %vm63_vm3 = vcmp.eq.s32.totalorder %v399_v34, %v61_v37 }
  0xad   :  { %vm54_vm4 = vcmp.eq.s32.totalorder %v46_v33, %v52_v38 }
  0xae   :  { %vm65_vm5 = vmor %vm54_vm4, %vm63_vm3 }
  0xaf   :  { %vm416_vm6 = vmpackc.low %vm65_vm5, %vm64_vm2 }
  0xb0   :  { %417 = vmatmul.mubr.msk.bf16.vlgmr.msra.gmra.mrb[0].mxu0 %vm416_vm6, %v573_v39 }
 0x183   :  { %v199_v44 = vpop.f32.mrb[0].mxu0 }
 0x184   :  { %v201_v45 = vpop.f32.mrb[1].mxu0  ;;  %v208_v47 = vmax.f32 %v199_v44, 0.0 }
 0x185   :  { %v203_v46 = vpop.f32.mrb[2].mxu0  ;;  %v209_v50 = vmax.f32 %v201_v45, 0.0 }
 0x186   :  { %v210_v48 = vmax.f32 %v203_v46, 0.0  ;;  %v205_v49 = vpop.f32.mrb[3].mxu0 }
 0x187   :  { %v211_v51 = vmax.f32 %v205_v49, 0.0 }
 0x188   :  { %v212_v52 = vpack.c.bf16 %v210_v48, %v208_v47 }
 0x189   :  { %v213_v53 = vpack.c.bf16 %v211_v51, %v209_v50 }
 0x18b   :  { %374 = vmatprep.mubr.bf16.mxu1 %v213_v53 }
 0x18c   :  { %375 = vmatmul.mubr.bf16.vlgmr.msra.gmra.mrb[0].mxu1 %v212_v52 }
 0x25f   :  { %v459_v54 = vpop.f32.mrb[0].mxu1 }
 0x260   :  { %v460_v55 = vpop.f32.mrb[1].mxu1 }
 0x261   :  { %v461_v56 = vadd.f32 %v460_v55, %v459_v54  ;;  %v462_v57 = vpop.f32.mrb[2].mxu1 }
 0x262   :  { %v463_v58 = vpop.f32.mrb[3].mxu1 }
 0x263   :  { %v464_v59 = vadd.f32 %v463_v58, %v462_v57 }
 0x265   :  { %v441_v60 = vpack.c.bf16 %v464_v59, %v461_v56 }
 0x267   :  { %442 = vst [vmem:[%s630_s3] sm:$0xff] %v441_v60  }
 0x268   :  { %397 = vsyncpa [#allocation3], 1 }
 0x269   :  { %398 = vsyncpa [#allocation5], 1 }

</bundles_post_ra>
